<compile_context>
chip_gen: v7x
topology: tpu7x:2x2x1
jax: 0.10.0
libtpu: 0.0.40
codegen_flags: <defaults>
</compile_context>

<pallas_src>
import functools

import jax
import jax.numpy as jnp
from jax import lax
from jax.experimental import pallas as pl
from jax.experimental.pallas import tpu as pltpu

NEG_SLOPE = 0.1


def _vmem_limit_bytes():
    """Generation-aware VMEM limit: ~75% of physical, capped at 96 MiB."""
    cap = 128 * 2**20
    try:
        info = pltpu.get_tpu_info()
        cap = int(getattr(info, "vmem_capacity_bytes", cap)) or cap
    except Exception:
        pass
    return max(32 * 2**20, min(96 * 2**20, int(0.75 * cap)))


def _pick_tile_rows(N, Hw, WpCin, NCOLS, pad, in_item, out_item, budget):
    """Largest row tile TH (multiple of 8 dividing Hw) whose per-step VMEM
    working set fits `budget`, preferring tiles that still leave >= ~4 grid
    steps (megacore sharding on v7x + DMA/compute overlap)."""
    cands = sorted((th for th in range(8, Hw + 1, 8) if Hw % th == 0),
                   reverse=True)

    def cost(th):
        in_blk = 2 * (th + 2 * pad) * WpCin * in_item   # double-buffered input block
        out_blk = 2 * th * NCOLS * out_item             # double-buffered output block
        acc = th * NCOLS * 4                            # f32 matmul accumulator
        slab = (th + 2 * pad) * WpCin * in_item         # loaded halo slab value
        tmp = th * NCOLS * out_item                     # store-side relayout temps
        return in_blk + out_blk + acc + slab + tmp

    feasible = [th for th in cands if cost(th) <= budget] or [cands[-1]]
    for th in feasible:                       # feasible is sorted large -> small
        if N * (Hw // th) >= 4:
            return th
    return feasible[-1]                       # grid is inherently small: most steps


def _upscale_kernel(x_ref, w_ref, b_ref, o_ref, *, TH, W, K, Cout, fuse):
    """One (batch, row-tile) grid step.

    x_ref: (1, 1, TH + K - 1, Wp*Cin)  halo row slab, lane-dense (w, cin) packing
    w_ref: (K, Wp*Cin, W*C4)           banded conv weights (resident, const map)
    b_ref: (1, W*C4)                   f32 bias, column order (c, i, w, j)
    o_ref: fused -> (1, Cout, 2*TH, 2*W)  final pixel-shuffled NCHW rows
           else  -> (1, TH, W*C4)         lane-dense activation rows
    """
    slab = x_ref[0, 0]                                    # one aligned load

    # K row-shifted static views of the single slab feed K MXU matmuls whose
    # banded RHS already encodes the kw taps -> no im2col, no masked stores.
    acc = jnp.dot(slab[0:TH], w_ref[0], preferred_element_type=jnp.float32)
    for kh in range(1, K):
        acc = acc + jnp.dot(slab[kh:kh + TH], w_ref[kh],
                            preferred_element_type=jnp.float32)

    acc = acc + b_ref[...]                                # bias (f32)
    acc = jnp.where(acc >= 0, acc, NEG_SLOPE * acc)       # LeakyReLU(0.1)
    out = acc.astype(o_ref.dtype)                         # (TH, W*C4), cols (c,i,w,j)

    if fuse:
        # PixelShuffle(2) fused into the store: with column order (c, i, w, j),
        # each per-channel (TH, 4W) slice reshapes row-major into the
        # (2*TH, 2*W) block of final NCHW rows -- no XLA epilogue pass at all.
        for c in range(Cout):
            o_ref[0, c] = out[:, c * 4 * W:(c + 1) * 4 * W].reshape(2 * TH, 2 * W)
    else:
        o_ref[0] = out                                    # single lane-dense store


def upscale_block(x_nchw, w_oihw, bias, *, kernel_size=3, stride=1,
                  compute_dtype=jnp.bfloat16):
    """Pallas implementation of UpscaleBlock.forward (stride=1)."""
    assert stride == 1, "UpscaleBlock Pallas kernel implements stride=1"
    N, Cin, H, W = x_nchw.shape
    C4, Cin_w, Kh, Kw = w_oihw.shape
    K = kernel_size
    assert Kh == Kw == K and Cin_w == Cin and K % 2 == 1
    assert C4 % 4 == 0, "conv out_channels must be 4*out_channels"
    Cout = C4 // 4
    pad = (K - 1) // 2
    out_dtype = x_nchw.dtype
    cdt = compute_dtype if compute_dtype is not None else x_nchw.dtype

    Wp = W + 2 * pad
    WpCin = Wp * Cin
    NCOLS = W * C4                         # columns ordered (c, i, w, j)
    Hw = ((H + 7) // 8) * 8                # worked rows: multiple of 8
    in_item = jnp.dtype(cdt).itemsize
    out_item = jnp.dtype(out_dtype).itemsize

    vmem_limit = _vmem_limit_bytes()
    budget = max(2 * 2**20,
                 int(0.8 * vmem_limit) - K * WpCin * NCOLS * in_item - NCOLS * 4)
    TH = _pick_tile_rows(N, Hw, WpCin, NCOLS, pad, in_item, out_item, budget)
    n_tiles = Hw // TH

    # ---- weights: banded, width-expanded matmul form (built once, resident) ----
    # M[kh, wp*Cin + cin, col(c,i,w,j)] = Wt[c*4+i*2+j, cin, kh, wp - w] when
    # 0 <= wp - w < K, else 0.  Zero band entries just multiply zeros on the MXU.
    A = jnp.transpose(w_oihw, (2, 3, 1, 0)).astype(jnp.float32)   # (K, K, Cin, C4)
    wp_ix = jnp.arange(Wp)
    w_ix = jnp.arange(W)
    M = jnp.zeros((K, Wp, Cin, W, C4), jnp.float32)
    for kw in range(K):
        sel = (wp_ix[:, None] == (w_ix[None, :] + kw)).astype(jnp.float32)  # (Wp, W)
        M = M + A[:, kw][:, None, :, None, :] * sel[None, :, None, :, None]
    M = M.reshape(K, Wp, Cin, W, Cout, 2, 2)           # [kh, wp, cin, w, c, i, j]
    M = jnp.transpose(M, (0, 1, 2, 4, 5, 3, 6))        # [kh, wp, cin, c, i, w, j]
    w_mat = M.reshape(K, WpCin, NCOLS).astype(cdt)
    # TODO(synk): w_mat is O(K*Cin*C4*W^2); for very wide images tile the W axis
    # (with its own halo) as well to bound the resident weight block.
    b_cols = jnp.broadcast_to(bias.astype(jnp.float32).reshape(Cout, 2, 1, 2),
                              (Cout, 2, W, 2)).reshape(1, NCOLS)

    # ---- input: NCHW -> lane-dense (N, rows, Wp*Cin), zero halo, row tiles ----
    x_nhwc = jnp.transpose(x_nchw, (0, 2, 3, 1)).astype(cdt)       # (N, H, W, Cin)
    x_p = jnp.pad(x_nhwc, ((0, 0), (pad, pad + (Hw - H)), (pad, pad), (0, 0)))
    x_p = x_p.reshape(N, Hw + 2 * pad, WpCin)
    # Overlapping halo row windows: each grid step only DMAs its own small slab;
    # the full image is never resident / double-buffered in VMEM.
    x_tiles = jnp.stack(
        [x_p[:, t * TH: t * TH + TH + 2 * pad, :] for t in range(n_tiles)],
        axis=1)                                        # (N, n_tiles, TH+2p, WpCin)

    # Fused PixelShuffle store when the final rows are lane-dense (2W % 128 == 0);
    # otherwise store the lane-dense (TH, W*C4) slab and do one XLA transpose.
    fuse = (2 * W) % 128 == 0
    kern = functools.partial(_upscale_kernel, TH=TH, W=W, K=K, Cout=Cout, fuse=fuse)

    if fuse:
        out_shape = jax.ShapeDtypeStruct((N, Cout, 2 * Hw, 2 * W), out_dtype)
        out_spec = pl.BlockSpec((1, Cout, 2 * TH, 2 * W), lambda n, t: (n, 0, t, 0))
    else:
        out_shape = jax.ShapeDtypeStruct((N, Hw, NCOLS), out_dtype)
        out_spec = pl.BlockSpec((1, TH, NCOLS), lambda n, t: (n, t, 0))

    y = pl.pallas_call(
        kern,
        out_shape=out_shape,
        grid_spec=pltpu.PrefetchScalarGridSpec(
            num_scalar_prefetch=0,
            grid=(N, n_tiles),
            in_specs=[
                pl.BlockSpec((1, 1, TH + 2 * pad, WpCin), lambda n, t: (n, t, 0, 0)),
                pl.BlockSpec((K, WpCin, NCOLS), lambda n, t: (0, 0, 0)),
                pl.BlockSpec((1, NCOLS), lambda n, t: (0, 0)),
            ],
            out_specs=out_spec,
        ),
        compiler_params=pltpu.CompilerParams(
            dimension_semantics=("parallel", "parallel"),
            vmem_limit_bytes=vmem_limit),
    )(x_tiles, w_mat, b_cols)

    if fuse:
        out = y if Hw == H else y[:, :, :2 * H, :]
        # TODO(synk): when H % 8 != 0 this slice is an extra output-sized copy;
        # handling the remainder rows inside the last tile would avoid it.
        return out
    y = y if Hw == H else y[:, :H, :]
    y = y.reshape(N, H, Cout, 2, 2 * W)               # cols (c, i, 2w+j)
    y = jnp.transpose(y, (0, 2, 1, 3, 4))             # (N, Cout, H, 2, 2W)
    return y.reshape(N, Cout, 2 * H, 2 * W)


def _reference_upscale_block(x_nchw, w_oihw, bias, compute_dtype=None):
    """Pure-JAX reference reproducing the PyTorch module (optionally with the
    same bf16 input/weight rounding as the kernel's MXU path)."""
    x = x_nchw.astype(jnp.float32)
    w = w_oihw.astype(jnp.float32)
    if compute_dtype is not None:
        x = x.astype(compute_dtype).astype(jnp.float32)
        w = w.astype(compute_dtype).astype(jnp.float32)
    y = lax.conv_general_dilated(
        x, w, window_strides=(1, 1), padding="SAME",
        dimension_numbers=("NCHW", "OIHW", "NCHW"),
        precision=lax.Precision.HIGHEST)
    y = y + bias[None, :, None, None].astype(jnp.float32)
    y = jnp.where(y >= 0, y, NEG_SLOPE * y)
    N, C4, H, W = y.shape
    C = C4 // 4
    y = y.reshape(N, C, 2, 2, H, W)
    y = jnp.transpose(y, (0, 1, 4, 2, 5, 3))
    return y.reshape(N, C, 2 * H, 2 * W)


if __name__ == "__main__":
    key = jax.random.PRNGKey(0)
    fn = jax.jit(upscale_block)

    cases = [
        # (batch, in_ch, out_ch, H, W)
        (2, 4, 4, 16, 16),   # module's canonical small shape (fallback path, 2W < 128)
        (1, 3, 2, 8, 64),    # fused PixelShuffle store path (2W == 128)
        (1, 3, 2, 10, 16),   # H not a multiple of 8 (row-padding path)
    ]
    for idx, (batch, in_ch, out_ch, H, W) in enumerate(cases):
        key, kx, kw, kb = jax.random.split(key, 4)
        x = jax.random.normal(kx, (batch, in_ch, H, W), dtype=jnp.float32)
        # Conv2d weight: (out_channels*4, in_channels, K, K), bias: (out_channels*4,)
        w = jax.random.normal(kw, (out_ch * 4, in_ch, 3, 3), dtype=jnp.float32) * 0.1
        b = jax.random.normal(kb, (out_ch * 4,), dtype=jnp.float32) * 0.1

        out = jax.block_until_ready(fn(x, w, b))
        assert out.shape == (batch, out_ch, 2 * H, 2 * W), (idx, out.shape)

        # Reference with matching bf16 input/weight rounding (f32 accumulation in both).
        ref = _reference_upscale_block(x, w, b, compute_dtype=jnp.bfloat16)
        err = float(jnp.max(jnp.abs(out.astype(jnp.float32) - ref)))
        assert err < 2e-2, (idx, err)

    print("KERNEL_OK")
</pallas_src>

<mosaic_0001>
module attributes {stable_mosaic.version = 11 : i64} {
  func.func @_upscale_kernel(%arg0: i32, %arg1: i32, %arg2: memref<1x1x10x72xbf16, #tpu.memory_space<vmem>>, %arg3: memref<3x72x256xbf16, #tpu.memory_space<vmem>>, %arg4: memref<1x256xf32, #tpu.memory_space<vmem>>, %arg5: memref<1x8x256xf32, #tpu.memory_space<vmem>>) attributes {dimension_semantics = [#tpu.dimension_semantics<parallel>, #tpu.dimension_semantics<parallel>], iteration_bounds = array<i64: 2, 2>, scalar_prefetch = 0 : i64, scratch_operands = 0 : i64, tpu.core_type = #tpu.core_type<tc>, window_params = [{transform_indices = @transform_0, window_bounds = array<i64: 1, 1, 10, 72>}, {pipeline_mode = #tpu.pipeline_mode<synchronous>, transform_indices = @transform_1, window_bounds = array<i64: 3, 72, 256>}, {pipeline_mode = #tpu.pipeline_mode<synchronous>, transform_indices = @transform_2, window_bounds = array<i64: 1, 256>}, {transform_indices = @transform_3, window_bounds = array<i64: 1, 8, 256>}]} {
    %c0 = arith.constant 0 : index
    %c0_0 = arith.constant 0 : index
    %c0_1 = arith.constant 0 : index
    %c0_2 = arith.constant 0 : index
    %0 = vector.load %arg2[%c0, %c0_0, %c0_1, %c0_2] : memref<1x1x10x72xbf16, #tpu.memory_space<vmem>>, vector<1x1x10x72xbf16>
    %1 = vector.shape_cast %0 : vector<1x1x10x72xbf16> to vector<10x72xbf16>
    %2 = vector.extract_strided_slice %1 {offsets = [0, 0], sizes = [8, 72], strides = [1, 1]} : vector<10x72xbf16> to vector<8x72xbf16>
    %c0_3 = arith.constant 0 : index
    %c0_4 = arith.constant 0 : index
    %c0_5 = arith.constant 0 : index
    %3 = vector.load %arg3[%c0_3, %c0_4, %c0_5] : memref<3x72x256xbf16, #tpu.memory_space<vmem>>, vector<1x72x256xbf16>
    %4 = vector.shape_cast %3 : vector<1x72x256xbf16> to vector<72x256xbf16>
    %cst = arith.constant dense<0.000000e+00> : vector<8x256xf32>
    %5 = tpu.matmul %2, %4, %cst {dimension_numbers = #tpu.dot_dimension_numbers<[1], [0], [0], [1], [0, 0, 1, 1], [], []>} : vector<8x72xbf16>, vector<72x256xbf16>, vector<8x256xf32> -> vector<8x256xf32>
    %6 = vector.extract_strided_slice %1 {offsets = [1, 0], sizes = [8, 72], strides = [1, 1]} : vector<10x72xbf16> to vector<8x72xbf16>
    %c1 = arith.constant 1 : index
    %c0_6 = arith.constant 0 : index
    %c0_7 = arith.constant 0 : index
    %7 = vector.load %arg3[%c1, %c0_6, %c0_7] : memref<3x72x256xbf16, #tpu.memory_space<vmem>>, vector<1x72x256xbf16>
    %8 = vector.shape_cast %7 : vector<1x72x256xbf16> to vector<72x256xbf16>
    %cst_8 = arith.constant dense<0.000000e+00> : vector<8x256xf32>
    %9 = tpu.matmul %6, %8, %cst_8 {dimension_numbers = #tpu.dot_dimension_numbers<[1], [0], [0], [1], [0, 0, 1, 1], [], []>} : vector<8x72xbf16>, vector<72x256xbf16>, vector<8x256xf32> -> vector<8x256xf32>
    %10 = arith.addf %5, %9 : vector<8x256xf32>
    %11 = vector.extract_strided_slice %1 {offsets = [2, 0], sizes = [8, 72], strides = [1, 1]} : vector<10x72xbf16> to vector<8x72xbf16>
    %c2 = arith.constant 2 : index
    %c0_9 = arith.constant 0 : index
    %c0_10 = arith.constant 0 : index
    %12 = vector.load %arg3[%c2, %c0_9, %c0_10] : memref<3x72x256xbf16, #tpu.memory_space<vmem>>, vector<1x72x256xbf16>
    %13 = vector.shape_cast %12 : vector<1x72x256xbf16> to vector<72x256xbf16>
    %cst_11 = arith.constant dense<0.000000e+00> : vector<8x256xf32>
    %14 = tpu.matmul %11, %13, %cst_11 {dimension_numbers = #tpu.dot_dimension_numbers<[1], [0], [0], [1], [0, 0, 1, 1], [], []>} : vector<8x72xbf16>, vector<72x256xbf16>, vector<8x256xf32> -> vector<8x256xf32>
    %15 = arith.addf %10, %14 : vector<8x256xf32>
    %c0_12 = arith.constant 0 : index
    %c0_13 = arith.constant 0 : index
    %16 = vector.load %arg4[%c0_12, %c0_13] : memref<1x256xf32, #tpu.memory_space<vmem>>, vector<1x256xf32>
    %17 = vector.broadcast %16 : vector<1x256xf32> to vector<8x256xf32>
    %18 = arith.addf %15, %17 : vector<8x256xf32>
    %cst_14 = arith.constant 0.000000e+00 : f32
    %19 = vector.broadcast %cst_14 : f32 to vector<8x256xf32>
    %20 = arith.cmpf oge, %18, %19 : vector<8x256xf32>
    %cst_15 = arith.constant 1.000000e-01 : f32
    %21 = vector.broadcast %cst_15 : f32 to vector<8x256xf32>
    %22 = arith.mulf %21, %18 : vector<8x256xf32>
    %23 = arith.select %20, %18, %22 : vector<8x256xi1>, vector<8x256xf32>
    %c0_16 = arith.constant 0 : index
    %c0_17 = arith.constant 0 : index
    %c0_18 = arith.constant 0 : index
    %24 = vector.load %arg5[%c0_16, %c0_17, %c0_18] : memref<1x8x256xf32, #tpu.memory_space<vmem>>, vector<1x8x256xf32>
    %25 = vector.shape_cast %24 : vector<1x8x256xf32> to vector<8x256xf32>
    %26 = vector.shape_cast %23 : vector<8x256xf32> to vector<1x8x256xf32>
    tpu.vector_store %arg5[%c0_16, %c0_17, %c0_18], %26 {strides = array<i32>} : memref<1x8x256xf32, #tpu.memory_space<vmem>>, vector<1x8x256xf32>,
    return
  }
  func.func @transform_0(%arg0: i32, %arg1: i32) -> (i32, i32, i32, i32) {
    %c0_i32 = arith.constant 0 : i32
    %c0_i32_0 = arith.constant 0 : i32
    %c0_i32_1 = arith.constant 0 : i32
    return %arg0, %arg1, %c0_i32, %c0_i32_0 : i32, i32, i32, i32
  }
  func.func @transform_1(%arg0: i32, %arg1: i32) -> (i32, i32, i32) {
    %c0_i32 = arith.constant 0 : i32
    %c0_i32_0 = arith.constant 0 : i32
    %c0_i32_1 = arith.constant 0 : i32
    %c0_i32_2 = arith.constant 0 : i32
    return %c0_i32, %c0_i32_0, %c0_i32_1 : i32, i32, i32
  }
  func.func @transform_2(%arg0: i32, %arg1: i32) -> (i32, i32) {
    %c0_i32 = arith.constant 0 : i32
    %c0_i32_0 = arith.constant 0 : i32
    %c0_i32_1 = arith.constant 0 : i32
    return %c0_i32, %c0_i32_0 : i32, i32
  }
  func.func @transform_3(%arg0: i32, %arg1: i32) -> (i32, i32, i32) {
    %c0_i32 = arith.constant 0 : i32
    %c0_i32_0 = arith.constant 0 : i32
    return %arg0, %arg1, %c0_i32 : i32, i32, i32
  }
}

</mosaic_0001>

<bundles_post_ra>
// kernel: upscale_block.1
= control target key start
LH: loop header
LB: loop body
LE: loop exit
PB: predicated region body
PF: predicated region fallthrough
CT: control target
= control target key end

     0   :  { %s1428_s0 = inlined_call_operand.hbm [shape: bf16[2,2,10,72], index: 0, kind: input, shape index: {}]   ;;  %s1429_s1 = inlined_call_operand.hbm [shape: bf16[3,72,256], index: 1, kind: input, shape index: {}]   ;;  %s1430_s2 = inlined_call_operand.hbm [shape: f32[1,256], index: 2, kind: input, shape index: {}]   ;;  %s1431_s3 = inlined_call_operand.hbm [shape: f32[2,16,256], index: 3, kind: output, shape index: {}]  }
   0x1   :  { %1439 = sst [smem:[#allocation15_spill]] %s1429_s1 }
   0x2   :  { %1440 = sst [smem:[#allocation16_spill]] %s1430_s2 }
   0x3   :  { %8 = vsyncpa [#allocation3], 0 }
   0x4   :  { %10 = vsyncpa [#allocation3 + $0x1], 0 }
   0x5   :  { %11 = vsyncpa [#allocation6], 0 }
   0x6   :  { %12 = vsyncpa [#allocation4], 0 }
   0x7   :  { %14 = vsyncpa [#allocation4 + $0x1], 0  ;;  %s1137_s12 = smov 0   ;;  %s1139_s13 = smov 0  }
   0x8   :  { %s1141_s14 = smov 0   ;;  %s1143_s15 = smov 0  }
   0x9   :  { %s1145_s16 = smov 0   ;;  %s1147_s17 = smov 0  }
   0xa   :  { %s1149_s18 = smov 0   ;;  %s1151_s19 = smov 0  }
   0xb LB: > { %1441 = sst [smem:[#allocation12_spill]] %s1078_s12  ;;  %s713_s20 = sadd.s32 4294967295, %s1106_s19   ;;  %s1106_s19 = sphi %s1151_s19, %s20_s19   ;;  %s1102_s18 = sphi %s1149_s18, %s1469_s18   ;;  %s1098_s17 = sphi %s1147_s17, %s1468_s17   ;;  %s1094_s16 = sphi %s1145_s16, %s1467_s16   ;;  %s1090_s15 = sphi %s1143_s15, %s1466_s15   ;;  %s1086_s14 = sphi %s1141_s14, %s1465_s14   ;;  %s1082_s13 = sphi %s1139_s13, %s1464_s13   ;;  %s1078_s12 = sphi %s1137_s12, %s1463_s12  }
   0xc   : > { %s714_s21 = sadd.s32 4294967294, %s1106_s19   ;;  %p54_p0 = scmp.ne.s32.totalorder %s1082_s13, %s1078_s12 }
   0xd   : > { %p1181_p1 = scmp.eq.s32.totalorder %s713_s20, 0  ;;  %p1185_p2 = scmp.eq.s32.totalorder %s713_s20, 3 }
   0xe   : > { %p128_p3 = scmp.eq.s32.totalorder %s714_s21, 3  ;;  %p715_p5 = scmp.ge.s32.totalorder %s1106_s19, 1 }
   0xf   : > { %s1442_s22 = scalar_select %p1181_p1, 1, 0 }
  0x10   : > { %s1443_s23 = scalar_select %p1185_p2, 1, 0 }
  0x11   : > { %p1191_p4 = por %p1181_p1, %p54_p0  ;;  %p1196_p6 = por %p128_p3, %p54_p0 }
  0x12   : > { %p135_p7 = scmp.lt.s32.totalorder %s1106_s19, 5  ;;  %s1108_s27 = smov [#allocation5]  }
  0x13   : > { %s1444_s24 = scalar_select %p1191_p4, 1, 0 }
  0x14   : > { %s1445_s25 = scalar_select %p1196_p6, 1, 0 }
  0x15   : > { %p1201_p8 = pnand %p715_p5, %p135_p7  ;;  %s147_s28 = sshll.u32 %s1108_s27, 4  ;;  %s148_s28 = int_to_ptr.vmem [resolvable:$true] %s147_s28 }
  0x16   : > { %1446 = sst [smem:[#allocation13_spill]] %s1445_s25  ;;  %s1109_s30 = smov [#allocation7]  }
  0x17   : > { %s1447_s26 = scalar_select %p1201_p8, 1, 0 }
  0x18   : > { %p783_p9 = pneg %p1201_p8  ;;  %s161_s4 = sshll.u32 %s1109_s30, 4  ;;  %s1213_s4 = int_to_ptr.vmem [resolvable:$true] %s161_s4 }
  0x19   : > { %s1449_s1 = sld [smem:[#allocation15_spill]] }
  0x1a   : > { %p1209_p10 = pnand %p783_p9, %p1181_p1 }
  0x1c   : > { %p920_p12 = pneg %p1209_p10 }
  0x1f   : > { %s918_s7 = scalar_lea.hbm %s1449_s1, 3456 }
  0x20   : > { %p919_p11 = scmp.ne.s32.totalorder %s1449_s1, %s918_s7  ;;  %p925_p3 = scmp.lt.u32.totalorder %s918_s7, %s1449_s1 }
  0x22   : > { %p921_p13 = pnand %p920_p12, %p919_p11 }
  0x24   : > { %p922_p0 = pneg %p921_p13 }
  0x26   : > { %p927_p5 = pnand %p925_p3, %p922_p0 }
  0x28   : > { %930 = shalt.err (!%p927_p5)
}
  0x29   : > { %s931_s20 = scalar_lea.vmem %s148_s28, 3456  ;;  %p939_p1 = scmp.lt.s32.totalorder %s148_s28, %s148_s28 }
  0x2a   : > { %p932_p7 = scmp.ne.s32.totalorder %s148_s28, %s931_s20  ;;  %p940_p4 = scmp.lt.s32.totalorder %s931_s20, %s931_s20 }
  0x2c   : > { %p934_p9 = pnand %p932_p7, %p920_p12  ;;  %p941_p8 = por %p940_p4, %p939_p1 }
  0x2e   : > { %p935_p6 = pneg %p934_p9 }
  0x30   : > { %p942_p2 = pnand %p941_p8, %p935_p6 }
  0x32   : > { %945 = shalt.err (!%p942_p2)
}
  0x33   : > { %s1110_s21 = smov 128   ;;  %s1111_s27 = smov 8  }
  0x34   : > { %786 = dma.hbm_to_vmem [thread:$0]  (!%p1209_p10), %s1449_s1, 3456, %s148_s28, [#allocation6], %s1110_s21, %s1110_s21, %s1111_s27  }
  0x35   : > { %s1450_s2 = sld [smem:[#allocation16_spill]] }
  0x3b   : > { %s946_s8 = scalar_lea.hbm %s1450_s2, 32 }
  0x3c   : > { %p947_p11 = scmp.ne.s32.totalorder %s1450_s2, %s946_s8  ;;  %p953_p4 = scmp.lt.u32.totalorder %s946_s8, %s1450_s2 }
  0x3e   : > { %p949_p1 = pnand %p947_p11, %p920_p12 }
  0x40   : > { %p950_p2 = pneg %p949_p1 }
  0x42   : > { %p955_p6 = pnand %p953_p4, %p950_p2 }
  0x44   : > { %958 = shalt.err (!%p955_p6)
}
  0x45   : > { %s959_s28 = scalar_lea.vmem %s1213_s4, 32  ;;  %p967_p3 = scmp.lt.s32.totalorder %s1213_s4, %s1213_s4 }
  0x46   : > { %p960_p8 = scmp.ne.s32.totalorder %s1213_s4, %s959_s28  ;;  %p968_p5 = scmp.lt.s32.totalorder %s959_s28, %s959_s28 }
  0x48   : > { %p962_p13 = pnand %p960_p8, %p920_p12  ;;  %p969_p7 = por %p968_p5, %p967_p3 }
  0x4a   : > { %p963_p0 = pneg %p962_p13 }
  0x4c   : > { %p970_p9 = pnand %p969_p7, %p963_p0 }
  0x4e   : > { %973 = shalt.err (!%p970_p9)
}
  0x4f   : > { %789 = dma.hbm_to_vmem [thread:$0]  (!%p1209_p10), %s1450_s2, 32, %s1213_s4, [#allocation6]  }
  0x50   : > { %s29_s30 = sadd.s32 1, %s1098_s17  ;;  %s32_s5 = sadd.s32 1, %s1102_s18 }
  0x51   : > { %p30_p12 = scmp.ge.s32.totalorder %s29_s30, 2  ;;  %s41_s29 = sadd.s32 1, %s1086_s14 }
  0x52   : > { %p48_p11 = scmp.ne.s32.totalorder %s1086_s14, %s1082_s13  ;;  %p49_p1 = scmp.eq.s32.totalorder %s1106_s19, 0 }
  0x53   : > { %s1471_s30 = smov (%p30_p12, %s29_s30), 0  ;;  %s1473_s5 = smov (!%p30_p12, %s32_s5), %s1102_s18 }
  0x54   : > { %1451 = sst [smem:[#allocation14_spill]] %s1471_s30  ;;  %s37_s6 = ssub.s32 %s1098_s17, %s1471_s30 }
  0x55   : > { %p1273_p2 = por %p49_p1, %p48_p11  ;;  %p34_p10 = scmp.ge.s32.totalorder %s1473_s5, 2 }
  0x56   : > { %p1453_p4 = scmp.ne.s32.totalorder %s1443_s23, 0  ;;  %p800_p8 = scmp.lt.s32.totalorder %s1106_s19, 4 }
  0x57   : > { %s172_s8 = sand.u32 1, %s1086_s14   ;;  %s1475_s5 = smov (%p34_p10, %s1473_s5), 0 }
  0x58   : > { %p1279_p6 = por %p1453_p4, %p48_p11  ;;  %s719_s9 = sshll.u32 %s172_s8, 3 }
  0x59   : > { %s36_s10 = ssub.s32 %s1102_s18, %s1475_s5  ;;  %s720_s20 = sshll.u32 %s1098_s17, 1 }
  0x5a   : > { %s38_s11 = sor.u32 %s37_s6, %s36_s10  ;;  %s721_s28 = sshll.u32 %s1102_s18, 2 }
  0x5b   : > { %p39_p13 = scmp.eq.s32.totalorder %s38_s11, 0  ;;  %s182_s21 = sadd.s32 %s721_s28, %s720_s20 }
  0x5c   : > { %s176_s27 = scalar_lea.vmem [#allocation2], %s719_s9  ;;  %s722_s2 = sshll.u32 %s182_s21, 6 }
  0x5d   : > { %s185_s23 = sshll.u32 %s176_s27, 4  ;;  %s1299_s12 = scalar_lea.hbm %s1428_s0, %s722_s2  ;;  %s1294_s23 = int_to_ptr.vmem [resolvable:$true] %s185_s23 }
  0x5e   : > { %s1292_s1 = scalar_select %p39_p13, %s1086_s14, %s41_s29  }
  0x5f   : > { %p1305_p0 = pnand %p800_p8, %p1273_p2  ;;  %s1309_s29 = scalar_lea.sflag [#allocation3], %s172_s8 }
  0x60   : > { %s974_s9 = scalar_lea.hbm %s1299_s12, 128  ;;  %s979_s30 = scalar_lea.hbm %s1428_s0, 512 }
  0x61   : > { %p975_p3 = scmp.ne.s32.totalorder %s1299_s12, %s974_s9  ;;  %p976_p5 = pneg %p1305_p0 }
  0x62   : > { %p980_p12 = scmp.lt.u32.totalorder %s1299_s12, %s1428_s0  ;;  %p981_p11 = scmp.lt.u32.totalorder %s979_s30, %s974_s9 }
  0x63   : > { %p977_p7 = pnand %p976_p5, %p975_p3  ;;  %p983_p2 = scmp.lt.u32.totalorder %s974_s9, %s1299_s12 }
  0x64   : > { %p982_p1 = por %p981_p11, %p980_p12 }
  0x65   : > { %p978_p9 = pneg %p977_p7 }
  0x66   : > { %p984_p10 = por %p983_p2, %p982_p1 }
  0x68   : > { %p985_p4 = pnand %p984_p10, %p978_p9 }
  0x6a   : > { %988 = shalt.err (!%p985_p4)
}
  0x6b   : > { %s989_s8 = scalar_lea.vmem %s1294_s23, 128  ;;  %s1112_s11 = smov [#allocation2]  }
  0x6c   : > { %p990_p8 = scmp.ne.s32.totalorder %s1294_s23, %s989_s8  ;;  %s994_s20 = sshll.u32 %s1112_s11, 4  ;;  %s995_s20 = int_to_ptr.vmem [resolvable:$false] %s994_s20 }
  0x6d   : > { %s996_s28 = scalar_lea.vmem %s995_s20, 256  ;;  %p997_p7 = scmp.lt.s32.totalorder %s1294_s23, %s995_s20 }
  0x6e   : > { %p992_p13 = pnand %p990_p8, %p976_p5  ;;  %p998_p12 = scmp.lt.s32.totalorder %s996_s28, %s989_s8 }
  0x70   : > { %p993_p3 = pneg %p992_p13  ;;  %p999_p11 = por %p998_p12, %p997_p7 }
  0x72   : > { %p1000_p1 = pnand %p999_p11, %p993_p3 }
  0x74   : > { %1003 = shalt.err (!%p1000_p1)
}
  0x75   : > { %s1113_s21 = smov 64   ;;  %s1114_s27 = smov 4  }
  0x76   : > { %793 = dma.hbm_to_vmem [thread:$0]  (!%p1305_p0), %s1299_s12, 128, %s1294_s23, %s1309_s29, %s1113_s21, %s1113_s21, %s1114_s27  }
  0x77   : > { %p1456_p5 = scmp.ne.s32.totalorder %s1447_s26, 0 }
  0x78   : > { %s1340_s9 = sand.u32 (!%p1456_p5), 1, %s1082_s13   ;;  %p1457_p9 = scmp.ne.s32.totalorder (!%p1456_p5), %s1444_s24, 0 }
  0x79   : > { %197 = sbr.rel (%p1456_p5) target bundleno = 408 (0x198), region = 32  ;;  %s724_s2 = sshll.u32 (!%p1456_p5), %s1340_s9, 3 }
  0x7a   : > { %s200_s25 = scalar_lea.sflag (!%p1456_p5), [#allocation3], %s1340_s9  ;;  %s1344_s30 = scalar_lea.vmem (!%p1456_p5), [#allocation2], %s724_s2 }
  0x80   : > { %1065 = dma.done.wait (%p1457_p9), %s200_s25, 128  }
  0x81   : > { %1067 = vsyncadd (%p1457_p9), %s200_s25, 4294967168  ;;  %p1458_p0 = scmp.ne.s32.totalorder %s1442_s22, 0 }
  0x83   : > { %1069 = dma.done.wait (%p1458_p0), [#allocation6], 3488  }
  0x84   : > { %1071 = vsyncadd (%p1458_p0), [#allocation6], 4294963808  ;;  %v1115_v0 = vmov 0   ;;  %v875_v1 = vld [vmem:[#allocation5 + $0x4c] ss:$8 sps:$4 sm:$0xff]   ;;  %v245_v17 = vld [vmem:[#allocation5 + $0x40] sm:$0xff]  ;;  %v570_v55 = vlaneseq }
  0x85   : > { %356 = vmatprep.mubr.bf16.mxu0 %v1115_v0  ;;  %451 = vmatprep.mubr.bf16.mxu1 %v1115_v0  ;;  %v877_v2 = vld [vmem:[#allocation5 + $0x4] ss:$8 sps:$4 sm:$0xff]   ;;  %v879_v3 = vld [vmem:[#allocation5 + $0x48] ss:$8 sps:$4 sm:$0xff]   ;;  %v883_v6 = vld [vmem:[#allocation5 + $0x14] ss:$8 sps:$4 sm:$0xff]   ;;  %v750_v23 = vcombine.high %v245_v17, %v245_v17  ;;  %v749_v25 = vcombine.low %v245_v17, %v245_v17 }
  0x86   : > { %324 = vmatprep.subr.bf16.mxu0 %v875_v1  ;;  %v880_v4 = vld [vmem:[#allocation5] ss:$8 sps:$4 sm:$0xff]   ;;  %419 = vmatprep.subr.bf16.mxu1 %v877_v2  ;;  %v881_v5 = vld [vmem:[#allocation5 + $0x5c] ss:$8 sps:$4 sm:$0xff]   ;;  %v886_v8 = vld [vmem:[#allocation5 + $0x10] ss:$8 sps:$4 sm:$0xff]  }
  0x87   : > { %325 = vmatpush1.bf16.msra.mxu0 %v879_v3  ;;  %420 = vmatpush1.bf16.msra.mxu1 %v880_v4  ;;  %v885_v7 = vld [vmem:[#allocation5 + $0x58] ss:$8 sps:$4 sm:$0xff]   ;;  %v887_v9 = vld [vmem:[#allocation5 + $0x6c] ss:$8 sps:$4 sm:$0xff]   ;;  %v891_v11 = vld [vmem:[#allocation5 + $0x68] ss:$8 sps:$4 sm:$0xff]  }
  0x88   : > { %326 = vmatprep.subr.bf16.mxu0 %v881_v5  ;;  %421 = vmatprep.subr.bf16.mxu1 %v883_v6  ;;  %v889_v10 = vld [vmem:[#allocation5 + $0x24] ss:$8 sps:$4 sm:$0xff]   ;;  %v892_v12 = vld [vmem:[#allocation5 + $0x20] ss:$8 sps:$4 sm:$0xff]   ;;  %v895_v14 = vld [vmem:[#allocation5 + $0x34] ss:$8 sps:$4 sm:$0xff]  }
  0x89   : > { %v893_v13 = vld [vmem:[#allocation5 + $0x7c] ss:$8 sps:$4 sm:$0xff]   ;;  %v897_v15 = vld [vmem:[#allocation5 + $0x78] ss:$8 sps:$4 sm:$0xff]   ;;  %v255_v16 = vld [vmem:[#allocation5 + $0x88] sm:$0xff]  ;;  %vm317_vm0 = vcmask 1043456  }
  0x8a   : > { %v235_v18 = vld [vmem:[%s1344_s30] sm:$0xf]  ;;  %v236_v19 = vld [vmem:[%s1344_s30 + $0x4] sm:$0x1]  ;;  %v738_v21 = vcombine.high %v255_v16, %v255_v16  ;;  %v737_v24 = vcombine.low %v255_v16, %v255_v16  ;;  %v414_v30 = vsel %vm317_vm0, %v749_v25, 0  ;;  %vm313_vm1 = vcmask 588800  }
  0x8b   : > { %327 = vmatpush1.bf16.msra.mxu0 %v885_v7  ;;  %422 = vmatpush1.bf16.msra.mxu1 %v886_v8  ;;  %v898_v20 = vld [vmem:[#allocation5 + $0x30] ss:$8 sps:$4 sm:$0xff]   ;;  %v728_v22 = vcombine.low %v235_v18, %v236_v19  ;;  %v906_v31 = vld [vmem:[#allocation5 + $0x94] ss:$8 sps:$4 sm:$0xff]   ;;  %v909_v34 = vld [vmem:[#allocation5 + $0xa4] ss:$8 sps:$4 sm:$0xff]  }
  0x8c   : > { %328 = vmatprep.subr.bf16.mxu0 %v887_v9  ;;  %423 = vmatprep.subr.bf16.mxu1 %v889_v10  ;;  %v319_v29 = vsel %vm317_vm0, %v737_v24, 0  ;;  %v904_v33 = vld [vmem:[#allocation5 + $0x90] ss:$8 sps:$4 sm:$0xff]   ;;  %v907_v35 = vld [vmem:[#allocation5 + $0xa0] ss:$8 sps:$4 sm:$0xff]   ;;  %v571_v56 = vshrl.u32 %v570_v55, 7 }
  0x8d   : > { %v264_v26 = vshll.u32 %v728_v22, 16  ;;  %v262_v27 = vshrl.u32 %v728_v22, 16  ;;  %v912_v36 = vld [vmem:[#allocation5 + $0xb4] ss:$8 sps:$4 sm:$0xff]   ;;  %v910_v37 = vld [vmem:[#allocation5 + $0xb0] ss:$8 sps:$4 sm:$0xff]  }
  0x8e   : > { %v915_v38 = vld [vmem:[#allocation5 + $0xc4] ss:$8 sps:$4 sm:$0xff]   ;;  %v469_v39 = vld [vmem:[#allocation5 + $0xd0] sm:$0xff]  ;;  %v913_v40 = vld [vmem:[#allocation5 + $0xc0] ss:$8 sps:$4 sm:$0xff]   ;;  %v470_v44 = vrot.slane %v728_v22, 1 }
  0x8f   : > { %329 = vmatpush1.bf16.msra.mxu0 %v891_v11  ;;  %424 = vmatpush1.bf16.msra.mxu1 %v892_v12  ;;  %v266_v28 = vrot.slane %v264_v26, 1  ;;  %v762_v41 = vcombine.high %v469_v39, %v469_v39  ;;  %v761_v42 = vcombine.low %v469_v39, %v469_v39  ;;  %v572_v57 = vsub.s32 0, %v571_v56  ;;  %v568_v58 = vld [vmem:[#allocation7] sm:$0x3]  ;;  %s727_s12 = sshll.u32 %s1340_s9, 4  ;;  %s766_s22 = sshll.u32 %s1090_s15, 1 }
  0x90   : > { %330 = vmatprep.subr.bf16.mxu0 %v893_v13  ;;  %425 = vmatprep.subr.bf16.mxu1 %v895_v14  ;;  %v576_v59 = vsub.s32 1, %v571_v56  ;;  %s767_s24 = sshll.u32 %s1094_s16, 2  ;;  %s233_s6 = scalar_lea.vmem [#allocation8], %s727_s12 }
  0x91   : > { %v267_v32 = vor.u32 %v266_v28, %v262_v27  ;;  %v520_v43 = vsel %vm317_vm0, %v761_v42, 0  ;;  %v573_v60 = vrot.slane %v568_v58, %v572_v57  ;;  %s603_s26 = sadd.s32 %s767_s24, %s766_s22  ;;  %s607_s29 = sshll.u32 %s233_s6, 4  ;;  %s1376_s29 = int_to_ptr.vmem [resolvable:$true] %s607_s29 }
  0x92   : > { %v577_v62 = vrot.slane %v568_v58, %v576_v59  ;;  %s768_s23 = sshll.u32 %s603_s26, 7  ;;  %s591_s10 = scalar_lea.sflag [#allocation4], %s1340_s9 }
  0x93   : > { %331 = vmatpush1.bf16.msra.mxu0 %v897_v15  ;;  %426 = vmatpush1.bf16.msra.mxu1 %v898_v20  ;;  %s1374_s7 = scalar_lea.hbm %s1431_s3, %s768_s23  ;;  %s1004_s8 = scalar_lea.vmem %s1376_s29, 256 }
  0x94   : > { %739 = vmatprep.subr.msk.bf16.mxu0 %vm317_vm0, %v738_v21  ;;  %751 = vmatprep.subr.msk.bf16.mxu1 %vm317_vm0, %v750_v23  ;;  %p1005_p2 = scmp.ne.s32.totalorder %s1376_s29, %s1004_s8  ;;  %s1116_s11 = smov [#allocation8]  }
  0x95   : > { %s1008_s20 = sshll.u32 %s1116_s11, 4  ;;  %s1009_s20 = int_to_ptr.vmem [resolvable:$false] %s1008_s20 }
  0x96   : > { %p1006_p10 = pnand %p1005_p2, %p1279_p6  ;;  %s1010_s28 = scalar_lea.vmem %s1009_s20, 512 }
  0x97   : > { %333 = vmatpush1.bf16.msra.mxu0 %v319_v29  ;;  %428 = vmatpush1.bf16.msra.mxu1 %v414_v30  ;;  %p1011_p8 = scmp.lt.s32.totalorder %s1376_s29, %s1009_s20  ;;  %p1012_p13 = scmp.lt.s32.totalorder %s1010_s28, %s1004_s8 }
  0x98   : > { %525 = vmatprep.subr.bf16.mxu0 %v906_v31  ;;  %p1007_p4 = pneg %p1006_p10 }
  0x99   : > { %p1013_p3 = por %p1012_p13, %p1011_p8 }
  0x9a   : > { %740 = vmatmul.mubr.msk.bf16.vlgmr.msra.gmra.mrb[0].mxu0 %vm313_vm1, %v267_v32  ;;  %752 = vmatmul.mubr.msk.bf16.vlgmr.msra.gmra.mrb[0].mxu1 %vm313_vm1, %v235_v18 }
  0x9b   : > { %526 = vmatpush1.bf16.msra.mxu0 %v904_v33  ;;  %557 = vmatprep.mubr.bf16.mxu0 %v1115_v0  ;;  %p1014_p7 = pnand %p1013_p3, %p1007_p4 }
  0x9c   : > { %527 = vmatprep.subr.bf16.mxu0 %v909_v34 }
  0x9f   : > { %528 = vmatpush1.bf16.msra.mxu0 %v907_v35 }
  0xa0   : > { %529 = vmatprep.subr.bf16.mxu0 %v912_v36 }
  0xa3   : > { %530 = vmatpush1.bf16.msra.mxu0 %v910_v37 }
  0xa4   : > { %531 = vmatprep.subr.bf16.mxu0 %v915_v38 }
  0xa7   : > { %532 = vmatpush1.bf16.msra.mxu0 %v913_v40 }
  0xa8   : > { %763 = vmatprep.subr.msk.bf16.mxu0 %vm317_vm0, %v762_v41 }
  0xab   : > { %534 = vmatpush1.bf16.msra.mxu0 %v520_v43 }
  0xae   : > { %764 = vmatmul.mubr.msk.bf16.vlgmr.msra.gmra.mrb[4].mxu0 %vm313_vm1, %v470_v44 }
 0x16d   : > { %v358_v45 = vpop.f32.mrb[0].mxu0  ;;  %v453_v46 = vpop.f32.mrb[0].mxu1 }
 0x16e   : > { %v454_v47 = vadd.f32 %v453_v46, %v358_v45  ;;  %v360_v48 = vpop.f32.mrb[1].mxu0  ;;  %v455_v49 = vpop.f32.mrb[1].mxu1 }
 0x16f   : > { %v456_v50 = vadd.f32 %v455_v49, %v360_v48  ;;  %v362_v51 = vpop.f32.mrb[2].mxu0  ;;  %v457_v52 = vpop.f32.mrb[2].mxu1 }
 0x170   : > { %v363_v53 = vpop.f32.mrb[3].mxu0  ;;  %v458_v54 = vpop.f32.mrb[3].mxu1 }
 0x181   : > { %v559_v61 = vpop.f32.mrb[4].mxu0 }
 0x182   : > { %v566_v63 = vadd.f32 %v559_v61, %v454_v47  ;;  %v561_v0 = vpop.f32.mrb[5].mxu0 }
 0x183   : > { %v567_v1 = vadd.f32 %v561_v0, %v456_v50  ;;  %v563_v2 = vpop.f32.mrb[6].mxu0 }
 0x184   : > { %v580_v3 = vadd.f32 %v573_v60, %v566_v63  ;;  %v564_v4 = vpop.f32.mrb[7].mxu0 }
 0x185   : > { %v581_v5 = vadd.f32 %v577_v62, %v567_v1 }
 0x186   : > { %vm582_vm2 = vcmp.ge.f32.partialorder %v580_v3, 0.0  ;;  %v584_v6 = vmul.f32 0.1, %v580_v3 }
 0x187   : > { %vm583_vm3 = vcmp.ge.f32.partialorder %v581_v5, 0.0  ;;  %v585_v7 = vmul.f32 0.1, %v581_v5 }
 0x188   : > { %v586_v8 = vsel %vm582_vm2, %v580_v3, %v584_v6 }
 0x189   : > { %v587_v9 = vsel %vm583_vm3, %v581_v5, %v585_v7  ;;  %588 = vst [vmem:[%s233_s6] sm:$0xff] %v586_v8 }
 0x18a   : > { %589 = vst [vmem:[%s233_s6 + $0x8] sm:$0xff] %v587_v9 }
 0x18b   : > { %1017 = shalt.err (!%p1014_p7)
}
 0x18c   : > { %s1018_s21 = scalar_lea.hbm %s1374_s7, 256  ;;  %s1022_s2 = scalar_lea.hbm %s1431_s3, 1024 }
 0x18d   : > { %p1019_p12 = scmp.ne.s32.totalorder %s1374_s7, %s1018_s21  ;;  %p1023_p5 = scmp.lt.u32.totalorder %s1374_s7, %s1431_s3 }
 0x18e   : > { %p1024_p9 = scmp.lt.u32.totalorder %s1022_s2, %s1018_s21  ;;  %p1026_p2 = scmp.lt.u32.totalorder %s1018_s21, %s1374_s7 }
 0x18f   : > { %p1020_p11 = pnand %p1019_p12, %p1279_p6 }
 0x190   : > { %p1025_p0 = por %p1024_p9, %p1023_p5 }
 0x191   : > { %p1021_p1 = pneg %p1020_p11 }
 0x192   : > { %p1027_p10 = por %p1026_p2, %p1025_p0 }
 0x194   : > { %p1028_p4 = pnand %p1027_p10, %p1021_p1 }
 0x196   : > { %1031 = shalt.err (!%p1028_p4)
}
 0x197   : > { %781 = dma.vmem_to_hbm [thread:$0]  (%p1279_p6), %s1376_s29, 256, %s1374_s7, %s591_s10  }
 0x198 PF: > { %s1459_s12 = sld [smem:[#allocation12_spill]]  ;;  %s1460_s22 = sld [smem:[#allocation13_spill]] }
 0x199   : > { %p803_p8 = scmp.ge.s32.totalorder %s1106_s19, 2 }
 0x19e   : > { %s619_s24 = sand.u32 1, %s1459_s12   ;;  %p1461_p13 = scmp.ne.s32.totalorder %s1460_s22, 0 }
 0x19f   : > { %s620_s26 = scalar_lea.sflag [#allocation4], %s619_s24 }
 0x1a0   : > { %p795_p3 = pnand %p803_p8, %p1461_p13 }
 0x1a2   : > { %1073 = dma.done.wait (!%p795_p3), %s620_s26, 256  }
 0x1a3   : > { %1075 = vsyncadd (!%p795_p3), %s620_s26, 4294967040  ;;  %s20_s19 = sadd.s32 1, %s1106_s19   ;;  %s1462_s4 = sld [smem:[#allocation14_spill]] }
 0x1a4   : > { %p17_p7 = scmp.ge.s32.totalorder %s20_s19, 6   ;;  %s1463_s12 = smov %s1082_s13 }
 0x1a5   : > { %s1464_s13 = smov %s1086_s14  ;;  %s1465_s14 = smov %s1292_s1 }
 0x1a6   : > { %s1466_s15 = smov %s1098_s17  ;;  %s1467_s16 = smov %s1102_s18 }
 0x1a7   : > { %s1469_s18 = smov %s1475_s5  ;;  %19 = sbr.rel (!%p17_p7) target bundleno = 11 (0xb), region = 87 }
 0x1a9   : > { %s1468_s17 = smov %s1462_s4 }
 0x1ae   :  { %625 = vsyncpa [#allocation3], 1 }
 0x1af   :  { %627 = vsyncpa [#allocation3 + $0x1], 1 }
 0x1b0   :  { %628 = vsyncpa [#allocation6], 1 }
 0x1b1   :  { %629 = vsyncpa [#allocation4], 1 }
 0x1b2   :  { %631 = vsyncpa [#allocation4 + $0x1], 1 }

</bundles_post_ra>
